<compile_context>
chip_gen: v5e
topology: v5e:2x2
jax: 0.10.0
libtpu: 0.0.40
codegen_flags: <defaults>
</compile_context>

<pallas_src>
import jax
import jax.numpy as jnp
from jax.experimental import pallas as pl
from jax.experimental.pallas import tpu as pltpu


# ---------------------------------------------------------------------------
# Pallas kernel: tiled y = x @ W + b
# ---------------------------------------------------------------------------
def _linear_kernel(x_ref, w_ref, b_ref, o_ref, acc_ref):
    k = pl.program_id(2)

    @pl.when(k == 0)
    def _():
        acc_ref[...] = jnp.zeros_like(acc_ref)

    acc_ref[...] += jnp.dot(
        x_ref[...], w_ref[...], preferred_element_type=jnp.float32
    )

    @pl.when(k == pl.num_programs(2) - 1)
    def _():
        # Epilogue: single bias add (f32) + single cast, hidden under MXU drain.
        o_ref[...] = (acc_ref[...] + b_ref[...]).astype(o_ref.dtype)


def _round_up(v, m):
    return ((v + m - 1) // m) * m


def pallas_linear(x, w, b, *, tm=256, tn=256, tk=512):
    """y = x @ w + b on the MXU.

    x: [N, Din], w: [Din, Dout] (pre-transposed vs torch.nn.Linear), b: [1, Dout].
    Inputs are zero-padded to tile multiples (lane-dense output), result is
    sliced back to [N, Dout].
    """
    n, d_in = x.shape
    d_out = w.shape[1]
    out_dtype = x.dtype

    # Shrink tiles for small problems while keeping (8, 128) alignment.
    tm = min(tm, _round_up(n, 8))
    tn = min(tn, _round_up(d_out, 128))
    tk = min(tk, _round_up(d_in, 128))

    n_p = _round_up(n, tm)
    k_p = _round_up(d_in, tk)
    m_p = _round_up(d_out, tn)

    x_p = jnp.pad(x, ((0, n_p - n), (0, k_p - d_in))) if (n_p != n or k_p != d_in) else x
    w_p = jnp.pad(w, ((0, k_p - d_in), (0, m_p - d_out))) if (k_p != d_in or m_p != d_out) else w
    b_p = jnp.pad(b, ((0, 0), (0, m_p - d_out))) if m_p != d_out else b

    grid = (n_p // tm, m_p // tn, k_p // tk)

    cost = pl.CostEstimate(
        flops=2 * n_p * k_p * m_p,
        transcendentals=0,
        bytes_accessed=4 * (n_p * k_p + k_p * m_p + n_p * m_p + m_p),
    )

    out_p = pl.pallas_call(
        _linear_kernel,
        out_shape=jax.ShapeDtypeStruct((n_p, m_p), out_dtype),
        grid_spec=pltpu.PrefetchScalarGridSpec(
            num_scalar_prefetch=0,
            grid=grid,
            in_specs=[
                pl.BlockSpec((tm, tk), lambda i, j, k: (i, k)),
                pl.BlockSpec((tk, tn), lambda i, j, k: (k, j)),
                pl.BlockSpec((1, tn), lambda i, j, k: (0, j)),
            ],
            out_specs=pl.BlockSpec((tm, tn), lambda i, j, k: (i, j)),
            scratch_shapes=[pltpu.VMEM((tm, tn), jnp.float32)],
        ),
        compiler_params=pltpu.CompilerParams(
            dimension_semantics=("parallel", "parallel", "arbitrary"),
        ),
        cost_estimate=cost,
    )(x_p, w_p, b_p)

    if n_p != n or m_p != d_out:
        out_p = out_p[:n, :d_out]
    return out_p


def identity_transform(x):
    # Default transformation = torch.nn.Identity(). No Pallas kernel: a pure
    # copy would just pay HBM bandwidth + dispatch overhead for zero compute.
    return x


# ---------------------------------------------------------------------------
# Plain-Python equivalents of TimeFrame / TimeFrameBuffer / Connection glue
# ---------------------------------------------------------------------------
class TimeFrame:
    def __init__(self, state, index, start_time, duration):
        self.state = state
        self.index = int(index)
        self.start_time = float(start_time)
        self.duration = float(duration)
        self.end_time = self.start_time + self.duration


class TimeFrameBuffer:
    ERROR_MARGIN = 1e-10

    def __init__(self):
        self._frames = []

    @property
    def time_frame_count(self):
        return len(self._frames)

    @property
    def end_time(self):
        if not self._frames:
            raise Exception("Cannot obtain end_time for empty TimeFrameBuffer.")
        return self._frames[-1].end_time

    def insert(self, time_frame):
        if self._frames and abs(time_frame.start_time - self.end_time) > self.ERROR_MARGIN:
            raise ValueError("Non-contiguous time frame insertion.")
        self._frames.append(time_frame)

    def pop(self):
        return self._frames.pop()


class Connection:
    """Connection whose `transformation` runs as a Pallas TPU kernel."""

    def __init__(self, from_area_index, to_area_index, output_time_frame_buffer,
                 transformation=None):
        self.from_area_index = from_area_index
        self.to_area_index = to_area_index
        self.output_time_frame_buffer = output_time_frame_buffer
        # transformation: callable jnp.ndarray -> jnp.ndarray
        self.transformation = (transformation if transformation is not None
                               else identity_transform)

    def forward(self, time_frame):
        transformed = self.transformation(time_frame.state)
        new_tf = TimeFrame(state=transformed,
                           index=time_frame.index,
                           start_time=time_frame.start_time,
                           duration=time_frame.duration)
        self.output_time_frame_buffer.insert(new_tf)

    def forward_many(self, time_frames):
        """Batched forward: stacks the states of several contiguous TimeFrames
        into one [B*N, Din] matrix so the transformation runs as a single,
        larger (MXU-resident) kernel instead of B tiny dispatches."""
        if not time_frames:
            return
        states = [tf.state for tf in time_frames]
        rows = [s.shape[0] for s in states]
        stacked = jnp.concatenate(states, axis=0)
        transformed = self.transformation(stacked)
        offset = 0
        for tf, r in zip(time_frames, rows):
            chunk = transformed[offset:offset + r]
            offset += r
            self.output_time_frame_buffer.insert(
                TimeFrame(state=chunk, index=tf.index,
                          start_time=tf.start_time, duration=tf.duration))

    __call__ = forward


# ---------------------------------------------------------------------------
# Demo / self-test
# ---------------------------------------------------------------------------
if __name__ == "__main__":
    key = jax.random.PRNGKey(0)
    k_x, k_w, k_b, k_x2, k_w2, k_b2 = jax.random.split(key, 6)

    instance_count = 8     # [instance count, dimensionality] per TimeFrame docstring
    in_dim = 32
    out_dim = 32

    # Deterministic parameters for a Linear "reference frame conversion".
    # (PyTorch nn.Linear weight is [out, in]; we store pre-transposed [in, out].)
    w = (jax.random.uniform(k_w, (in_dim, out_dim), jnp.float32) - 0.5) * (2.0 / jnp.sqrt(in_dim))
    b = (jax.random.uniform(k_b, (1, out_dim), jnp.float32) - 0.5) * (2.0 / jnp.sqrt(in_dim))
    x = jax.random.normal(k_x, (instance_count, in_dim), jnp.float32)

    # --- Connection with default Identity transformation (no kernel launch) ---
    buf_id = TimeFrameBuffer()
    conn_id = Connection(0, 1, buf_id)  # default Identity
    tf_in = TimeFrame(state=x, index=0, start_time=0.0, duration=0.1)
    conn_id(tf_in)
    out_id = jax.block_until_ready(buf_id.pop().state)
    assert jnp.allclose(out_id, x), "Identity transformation mismatch"

    # --- Connection with Linear transformation (tiled matmul + bias kernel) ---
    buf_lin = TimeFrameBuffer()
    conn_lin = Connection(0, 1, buf_lin, transformation=lambda s: pallas_linear(s, w, b))
    conn_lin(tf_in)
    out_tf = buf_lin.pop()
    out_lin = jax.block_until_ready(out_tf.state)

    ref = x @ w + b
    assert out_lin.shape == (instance_count, out_dim)
    assert out_tf.index == tf_in.index
    assert out_tf.start_time == tf_in.start_time
    assert out_tf.duration == tf_in.duration
    assert jnp.allclose(out_lin, ref, atol=1e-5, rtol=1e-5), "Linear transformation mismatch"

    # --- Batched forward over multiple contiguous TimeFrames ---
    buf_batch = TimeFrameBuffer()
    conn_batch = Connection(0, 1, buf_batch, transformation=lambda s: pallas_linear(s, w, b))
    frames = []
    t = 0.0
    for i in range(3):
        xi = jax.random.normal(jax.random.fold_in(k_x, i), (instance_count, in_dim), jnp.float32)
        frames.append(TimeFrame(state=xi, index=i, start_time=t, duration=0.1))
        t += 0.1
    conn_batch.forward_many(frames)
    for fr in reversed(frames):
        got = jax.block_until_ready(buf_batch.pop().state)
        want = fr.state @ w + b
        # buffer pops from the latest end
    # (re-check in order for clarity)
    conn_batch.forward_many(frames)
    popped = [buf_batch.pop() for _ in range(3)][::-1]
    for fr, out_fr in zip(frames, popped):
        assert out_fr.index == fr.index
        assert jnp.allclose(out_fr.state, fr.state @ w + b, atol=1e-5, rtol=1e-5), \
            "Batched linear transformation mismatch"

    # --- Larger, non-aligned problem: exercises padding + multi-step grid ---
    n2, din2, dout2 = 300, 520, 260
    x2 = jax.random.normal(k_x2, (n2, din2), jnp.float32)
    w2 = (jax.random.uniform(k_w2, (din2, dout2), jnp.float32) - 0.5) * (2.0 / jnp.sqrt(din2))
    b2 = (jax.random.uniform(k_b2, (1, dout2), jnp.float32) - 0.5) * (2.0 / jnp.sqrt(din2))
    out2 = jax.block_until_ready(pallas_linear(x2, w2, b2))
    ref2 = x2 @ w2 + b2
    assert out2.shape == (n2, dout2)
    assert jnp.allclose(out2, ref2, atol=1e-4, rtol=1e-4), "Gridded linear mismatch"

    print("KERNEL_OK")
</pallas_src>

<mosaic_0001>
module attributes {stable_mosaic.version = 11 : i64} {
  func.func @_linear_kernel(%arg0: i32, %arg1: i32, %arg2: i32, %arg3: memref<8x128xf32, #tpu.memory_space<vmem>>, %arg4: memref<128x128xf32, #tpu.memory_space<vmem>>, %arg5: memref<1x128xf32, #tpu.memory_space<vmem>>, %arg6: memref<8x128xf32, #tpu.memory_space<vmem>>, %arg7: memref<8x128xf32, #tpu.memory_space<vmem>>) attributes {dimension_semantics = [#tpu.dimension_semantics<parallel>, #tpu.dimension_semantics<parallel>, #tpu.dimension_semantics<arbitrary>], iteration_bounds = array<i64: 1, 1, 1>, scalar_prefetch = 0 : i64, scratch_operands = 1 : i64, tpu.core_type = #tpu.core_type<tc>, window_params = [{transform_indices = @transform_0, window_bounds = array<i64: 8, 128>}, {transform_indices = @transform_1, window_bounds = array<i64: 128, 128>}, {transform_indices = @transform_2, window_bounds = array<i64: 1, 128>}, {transform_indices = @transform_3, window_bounds = array<i64: 8, 128>}]} {
    %c0_i32 = arith.constant 0 : i32
    %0 = arith.cmpi eq, %arg2, %c0_i32 : i32
    %1 = arith.extui %0 : i1 to i32
    %c0_i32_0 = arith.constant 0 : i32
    %2 = arith.cmpi ne, %1, %c0_i32_0 : i32
    scf.if %2 {
      %cst_10 = arith.constant 0.000000e+00 : f32
      %12 = vector.broadcast %cst_10 : f32 to vector<8x128xf32>
      %c0_11 = arith.constant 0 : index
      %c0_12 = arith.constant 0 : index
      %13 = vector.load %arg7[%c0_11, %c0_12] : memref<8x128xf32, #tpu.memory_space<vmem>>, vector<8x128xf32>
      tpu.vector_store %arg7[%c0_11, %c0_12], %12 {strides = array<i32>} : memref<8x128xf32, #tpu.memory_space<vmem>>, vector<8x128xf32>,
    } else {
    }
    %c0 = arith.constant 0 : index
    %c0_1 = arith.constant 0 : index
    %3 = vector.load %arg7[%c0, %c0_1] : memref<8x128xf32, #tpu.memory_space<vmem>>, vector<8x128xf32>
    %c0_2 = arith.constant 0 : index
    %c0_3 = arith.constant 0 : index
    %4 = vector.load %arg3[%c0_2, %c0_3] : memref<8x128xf32, #tpu.memory_space<vmem>>, vector<8x128xf32>
    %c0_4 = arith.constant 0 : index
    %c0_5 = arith.constant 0 : index
    %5 = vector.load %arg4[%c0_4, %c0_5] : memref<128x128xf32, #tpu.memory_space<vmem>>, vector<128x128xf32>
    %cst = arith.constant dense<0.000000e+00> : vector<8x128xf32>
    %6 = tpu.matmul %4, %5, %cst {dimension_numbers = #tpu.dot_dimension_numbers<[1], [0], [0], [1], [0, 0, 1, 1], [], []>} : vector<8x128xf32>, vector<128x128xf32>, vector<8x128xf32> -> vector<8x128xf32>
    %7 = arith.addf %3, %6 : vector<8x128xf32>
    %c0_6 = arith.constant 0 : index
    %c0_7 = arith.constant 0 : index
    %8 = vector.load %arg7[%c0_6, %c0_7] : memref<8x128xf32, #tpu.memory_space<vmem>>, vector<8x128xf32>
    tpu.vector_store %arg7[%c0_6, %c0_7], %7 {strides = array<i32>} : memref<8x128xf32, #tpu.memory_space<vmem>>, vector<8x128xf32>,
    %c0_i32_8 = arith.constant 0 : i32
    %9 = arith.cmpi eq, %arg2, %c0_i32_8 : i32
    %10 = arith.extui %9 : i1 to i32
    %c0_i32_9 = arith.constant 0 : i32
    %11 = arith.cmpi ne, %10, %c0_i32_9 : i32
    scf.if %11 {
      %c0_10 = arith.constant 0 : index
      %c0_11 = arith.constant 0 : index
      %12 = vector.load %arg7[%c0_10, %c0_11] : memref<8x128xf32, #tpu.memory_space<vmem>>, vector<8x128xf32>
      %c0_12 = arith.constant 0 : index
      %c0_13 = arith.constant 0 : index
      %13 = vector.load %arg5[%c0_12, %c0_13] : memref<1x128xf32, #tpu.memory_space<vmem>>, vector<1x128xf32>
      %14 = vector.broadcast %13 : vector<1x128xf32> to vector<8x128xf32>
      %15 = arith.addf %12, %14 : vector<8x128xf32>
      %c0_14 = arith.constant 0 : index
      %c0_15 = arith.constant 0 : index
      %16 = vector.load %arg6[%c0_14, %c0_15] : memref<8x128xf32, #tpu.memory_space<vmem>>, vector<8x128xf32>
      tpu.vector_store %arg6[%c0_14, %c0_15], %15 {strides = array<i32>} : memref<8x128xf32, #tpu.memory_space<vmem>>, vector<8x128xf32>,
    } else {
    }
    return
  }
  func.func @transform_0(%arg0: i32, %arg1: i32, %arg2: i32) -> (i32, i32) {
    %c0_i32 = arith.constant 0 : i32
    return %arg0, %arg2 : i32, i32
  }
  func.func @transform_1(%arg0: i32, %arg1: i32, %arg2: i32) -> (i32, i32) {
    %c0_i32 = arith.constant 0 : i32
    return %arg2, %arg1 : i32, i32
  }
  func.func @transform_2(%arg0: i32, %arg1: i32, %arg2: i32) -> (i32, i32) {
    %c0_i32 = arith.constant 0 : i32
    %c0_i32_0 = arith.constant 0 : i32
    return %c0_i32, %arg1 : i32, i32
  }
  func.func @transform_3(%arg0: i32, %arg1: i32, %arg2: i32) -> (i32, i32) {
    %c0_i32 = arith.constant 0 : i32
    return %arg0, %arg1 : i32, i32
  }
}

</mosaic_0001>

<bundles_post_ra>
// kernel: tpu_custom_call.1
= control target key start
LH: loop header
LB: loop body
LE: loop exit
PB: predicated region body
PF: predicated region fallthrough
CT: control target
= control target key end

     0   :  { %8 = vsyncpa [#allocation4], 0  ;;  %s239_s0 = inlined_call_operand.hbm [shape: f32[8,128], index: 0, kind: input, shape index: {}]   ;;  %s240_s1 = inlined_call_operand.hbm [shape: f32[128,128], index: 1, kind: input, shape index: {}]   ;;  %s241_s2 = inlined_call_operand.vmem [shape: f32[1,128], index: 2, kind: input, shape index: {}]   ;;  %s242_s3 = inlined_call_operand.hbm [shape: f32[8,128], index: 3, kind: output, shape index: {}]  }
   0x1   :  { %9 = vsyncpa [#allocation7], 0 }
   0x2   :  { %10 = vsyncpa [#allocation5], 0  ;;  %s16_s14 = sshll.u32 %s239_s0, 4  ;;  %s202_s15 = smov [#allocation3]   ;;  %s17_s14 = int_to_ptr.hbm [resolvable:$true] %s16_s14 }
   0x3   :  { %s18_s16 = sshll.u32 %s202_s15, 4  ;;  %s26_s19 = sshll.u32 %s240_s1, 4  ;;  %s19_s16 = int_to_ptr.vmem [resolvable:$true] %s18_s16  ;;  %s27_s19 = int_to_ptr.hbm [resolvable:$true] %s26_s19 }
   0x4   :  { %21 = dma.hbm_to_vmem [thread:$0]  %s17_s14, 128, %s19_s16, [#allocation4]  }
   0x5   :  { %s203_s20 = smov [#allocation6]   ;;  %s204_s22 = smov 128  }
   0x6   :  { %s28_s21 = sshll.u32 %s203_s20, 4  ;;  %s205_s23 = smov 8   ;;  %s29_s21 = int_to_ptr.vmem [resolvable:$true] %s28_s21 }
   0x7   :  { %34 = dma.hbm_to_vmem [thread:$0]  %s27_s19, 2048, %s29_s21, [#allocation7], %s204_s22, %s204_s22, %s205_s23  }
   0x8   :  { %196 = dma.done.wait [#allocation4], 128  }
   0x9   :  { %197 = vsyncadd [#allocation4], 4294967168 }
   0xa   :  { %198 = dma.done.wait [#allocation7], 2048  }
   0xb   :  { %199 = vsyncadd [#allocation7], 4294965248  ;;  %v67_v0 = vld [vmem:[#allocation6 + $0x78] sm:$0xff]  ;;  %v66_v1 = vld [vmem:[#allocation6 + $0x70] sm:$0xff]  ;;  %s206_s24 = smov [#allocation8]   ;;  %s107_s28 = sshll.u32 %s242_s3, 4  ;;  %s108_s28 = int_to_ptr.hbm [resolvable:$true] %s107_s28 }
   0xc   :  { %68 = vmatpush.msra.mxu0 %v67_v0  ;;  %v65_v2 = vld [vmem:[#allocation6 + $0x68] sm:$0xff]  ;;  %v64_v3 = vld [vmem:[#allocation6 + $0x60] sm:$0xff]  ;;  %v63_v4 = vld [vmem:[#allocation6 + $0x58] sm:$0xff]  ;;  %s105_s25 = sshll.u32 %s206_s24, 4  ;;  %s106_s25 = int_to_ptr.vmem [resolvable:$true] %s105_s25 }
   0xd   :  { %v62_v5 = vld [vmem:[#allocation6 + $0x50] sm:$0xff]  ;;  %v61_v6 = vld [vmem:[#allocation6 + $0x48] sm:$0xff]  ;;  %v60_v7 = vld [vmem:[#allocation6 + $0x40] sm:$0xff] }
   0xe   :  { %69 = vmatpush.msra.mxu0 %v66_v1  ;;  %v59_v8 = vld [vmem:[#allocation6 + $0x38] sm:$0xff]  ;;  %v58_v9 = vld [vmem:[#allocation6 + $0x30] sm:$0xff]  ;;  %v57_v10 = vld [vmem:[#allocation6 + $0x28] sm:$0xff] }
   0xf   :  { %v56_v11 = vld [vmem:[#allocation6 + $0x20] sm:$0xff]  ;;  %v55_v12 = vld [vmem:[#allocation6 + $0x18] sm:$0xff]  ;;  %v54_v13 = vld [vmem:[#allocation6 + $0x10] sm:$0xff] }
  0x10   :  { %70 = vmatpush.msra.mxu0 %v65_v2  ;;  %v53_v14 = vld [vmem:[#allocation6 + $0x8] sm:$0xff]  ;;  %v52_v15 = vld [vmem:[#allocation6] sm:$0xff]  ;;  %v51_v16 = vld [vmem:[#allocation3] sm:$0xff] }
  0x11   :  { %v123_v17 = vld [vmem:[%s241_s2] ss:$0 sm:$0xff] }
  0x12   :  { %71 = vmatpush.msra.mxu0 %v64_v3 }
  0x14   :  { %72 = vmatpush.msra.mxu0 %v63_v4 }
  0x16   :  { %73 = vmatpush.msra.mxu0 %v62_v5 }
  0x18   :  { %74 = vmatpush.msra.mxu0 %v61_v6 }
  0x1a   :  { %75 = vmatpush.msra.mxu0 %v60_v7 }
  0x1c   :  { %76 = vmatpush.msra.mxu0 %v59_v8 }
  0x1e   :  { %77 = vmatpush.msra.mxu0 %v58_v9 }
  0x20   :  { %78 = vmatpush.msra.mxu0 %v57_v10 }
  0x22   :  { %79 = vmatpush.msra.mxu0 %v56_v11 }
  0x24   :  { %80 = vmatpush.msra.mxu0 %v55_v12 }
  0x26   :  { %81 = vmatpush.msra.mxu0 %v54_v13 }
  0x28   :  { %82 = vmatpush.msra.mxu0 %v53_v14 }
  0x2a   :  { %83 = vmatpush.msra.mxu0 %v52_v15 }
  0x2b   :  { %84 = vmatmul.f32.vlgmr.msra.gmra.mxu0 %v51_v16 }
  0xa8   :  { %v85_v18 = vpop.f32.mrf.mxu0 }
  0xa9   :  { %v98_v19 = vadd.f32 %v123_v17, %v85_v18 }
  0xab   :  { %99 = vst [vmem:[#allocation8] sm:$0xff] %v98_v19 }
  0xac   :  { %110 = dma.vmem_to_hbm [thread:$0]  %s106_s25, 128, %s108_s28, [#allocation5]  }
  0xad   :  { %200 = dma.done.wait [#allocation5], 128  }
  0xae   :  { %201 = vsyncadd [#allocation5], 4294967168 }
  0xaf   :  { %115 = vsyncpa [#allocation4], 1 }
  0xb0   :  { %116 = vsyncpa [#allocation7], 1 }
  0xb1   :  { %117 = vsyncpa [#allocation5], 1 }

</bundles_post_ra>
